<compile_context>
chip_gen: v5e
topology: v5e:2x2
jax: 0.10.0
libtpu: 0.0.40
codegen_flags: <defaults>
</compile_context>

<pallas_src>
import functools

import jax
import jax.numpy as jnp
from jax import lax
from jax.experimental import pallas as pl
from jax.experimental.pallas import tpu as pltpu


def _round_up(x, m):
    return ((x + m - 1) // m) * m


def _maybe_cast(x, dtype):
    return x if x.dtype == dtype else x.astype(dtype)


# ---------------------------------------------------------------------------
# Kernel
# ---------------------------------------------------------------------------
def critic_kernel(x_ref, w1_ref, b1_ref, w2_ref, b2_ref, wh_ref, bh_ref,
                  out_ref, *, n_actions):
    """One batch tile. Weights are resident (constant block index) across grid.

    x_ref:  [tm, n_input]  f32
    w1_ref: [n_input, H]   dot dtype (f32 or bf16)
    w2_ref: [H, H]         dot dtype
    wh_ref: [H, N_pad]     fused mu|sigma head, zero-padded to lane width
    b*_ref: [1, *]         f32
    out_ref:[tm, N_pad]    f32 packed (mu | clipped sigma | zero pad)
    """
    x = _maybe_cast(x_ref[...], w1_ref.dtype)

    # fc1 + relu (accumulate / bias / relu in f32)
    h1 = jnp.dot(x, w1_ref[...], preferred_element_type=jnp.float32) + b1_ref[...]
    h1 = jnp.maximum(h1, 0.0)

    # fc2 + relu
    h2 = jnp.dot(_maybe_cast(h1, w2_ref.dtype), w2_ref[...],
                 preferred_element_type=jnp.float32) + b2_ref[...]
    h2 = jnp.maximum(h2, 0.0)

    # fused mu|sigma head: one lane-dense MXU dot
    y = jnp.dot(_maybe_cast(h2, wh_ref.dtype), wh_ref[...],
                preferred_element_type=jnp.float32) + bh_ref[...]

    # clamp only the sigma columns [n_actions, 2*n_actions) to [1e-6, 1] in f32
    col = lax.broadcasted_iota(jnp.int32, y.shape, 1)
    sigma_cols = (col >= n_actions) & (col < 2 * n_actions)
    y = jnp.where(sigma_cols, jnp.clip(y, 1e-6, 1.0), y)

    out_ref[...] = y.astype(out_ref.dtype)


# ---------------------------------------------------------------------------
# One-time parameter prep (outside the hot path)
# ---------------------------------------------------------------------------
def prepare_params(params, dot_dtype=jnp.bfloat16):
    """Transpose PyTorch (out,in) weights, fuse+pad the heads, cast MXU operands."""
    H = params["b1"].shape[0]
    n_actions = params["bmu"].shape[0]
    n_head = 2 * n_actions
    n_pad = max(128, _round_up(n_head, 128))

    w1 = params["w1"].T.astype(dot_dtype)                    # [n_input, H]
    b1 = params["b1"].reshape(1, H).astype(jnp.float32)
    w2 = params["w2"].T.astype(dot_dtype)                    # [H, H]
    b2 = params["b2"].reshape(1, H).astype(jnp.float32)

    wh = jnp.concatenate([params["wmu"].T, params["wsig"].T], axis=1)  # [H, 2A]
    bh = jnp.concatenate([params["bmu"], params["bsig"]]).reshape(1, n_head)
    wh = jnp.pad(wh, ((0, 0), (0, n_pad - n_head))).astype(dot_dtype)
    bh = jnp.pad(bh, ((0, 0), (0, n_pad - n_head))).astype(jnp.float32)

    prep = dict(w1=w1, b1=b1, w2=w2, b2=b2, wh=wh, bh=bh)
    return prep, n_actions, n_pad


def build_critic_forward(params, *, dot_dtype=jnp.bfloat16, block_batch=256):
    """Returns a jitted `state -> (mu, sigma)` using pre-prepared weights."""
    prep, n_actions, n_pad = prepare_params(params, dot_dtype)
    n_input, H = prep["w1"].shape
    kernel = functools.partial(critic_kernel, n_actions=n_actions)

    @jax.jit
    def forward(state):
        B = state.shape[0]
        tm = min(block_batch, max(8, _round_up(B, 8)))   # batch tile (mult of 8)
        b_pad = _round_up(B, tm)
        x = state
        if b_pad != B:
            x = jnp.pad(x, ((0, b_pad - B), (0, 0)))

        flops = 2 * b_pad * (n_input * H + H * H + H * n_pad)
        bytes_accessed = int(
            x.size * x.dtype.itemsize
            + sum(int(a.size) * a.dtype.itemsize for a in prep.values())
            + b_pad * n_pad * 4
        )

        packed = pl.pallas_call(
            kernel,
            out_shape=jax.ShapeDtypeStruct((b_pad, n_pad), jnp.float32),
            grid=(b_pad // tm,),
            in_specs=[
                pl.BlockSpec((tm, n_input), lambda i: (i, 0)),   # state tile
                pl.BlockSpec((n_input, H), lambda i: (0, 0)),    # w1 (resident)
                pl.BlockSpec((1, H), lambda i: (0, 0)),          # b1
                pl.BlockSpec((H, H), lambda i: (0, 0)),          # w2 (resident)
                pl.BlockSpec((1, H), lambda i: (0, 0)),          # b2
                pl.BlockSpec((H, n_pad), lambda i: (0, 0)),      # fused heads
                pl.BlockSpec((1, n_pad), lambda i: (0, 0)),      # fused bias
            ],
            out_specs=pl.BlockSpec((tm, n_pad), lambda i: (i, 0)),
            compiler_params=pltpu.CompilerParams(
                dimension_semantics=("parallel",)),
            cost_estimate=pl.CostEstimate(
                flops=int(flops), transcendentals=0,
                bytes_accessed=bytes_accessed),
        )(x, prep["w1"], prep["b1"], prep["w2"], prep["b2"],
          prep["wh"], prep["bh"])

        mu = packed[:B, :n_actions]
        sigma = packed[:B, n_actions:2 * n_actions]
        return mu, sigma

    return forward


# ---------------------------------------------------------------------------
# Test scaffolding
# ---------------------------------------------------------------------------
def init_params(key, n_input, n_actions, hidden=256):
    """Deterministic synthetic init (PyTorch-Linear-style uniform fan-in)."""
    ks = jax.random.split(key, 8)

    def lin(kw, kb, fan_in, fan_out):
        bound = 1.0 / jnp.sqrt(fan_in)
        w = jax.random.uniform(kw, (fan_out, fan_in), jnp.float32, -bound, bound)
        b = jax.random.uniform(kb, (fan_out,), jnp.float32, -bound, bound)
        return w, b

    w1, b1 = lin(ks[0], ks[1], n_input, hidden)
    w2, b2 = lin(ks[2], ks[3], hidden, hidden)
    wmu, bmu = lin(ks[4], ks[5], hidden, n_actions)
    wsig, bsig = lin(ks[6], ks[7], hidden, n_actions)
    return dict(w1=w1, b1=b1, w2=w2, b2=b2,
                wmu=wmu, bmu=bmu, wsig=wsig, bsig=bsig)


def reference_forward(state, p):
    h1 = jnp.maximum(state @ p["w1"].T + p["b1"], 0.0)
    h2 = jnp.maximum(h1 @ p["w2"].T + p["b2"], 0.0)
    mu = h2 @ p["wmu"].T + p["bmu"]
    sigma = jnp.clip(h2 @ p["wsig"].T + p["bsig"], 1e-6, 1.0)
    return mu, sigma


# TODO(synk): .sample() (Normal rsample + tanh squashing + log-prob) and the Adam
# optimizer are outside forward(); not implemented as kernels.

if __name__ == "__main__":
    key = jax.random.PRNGKey(0)
    k_params, k_state = jax.random.split(key)

    B, n_input, n_actions = 8, 32, 8   # small shapes consistent with the module
    params = init_params(k_params, n_input, n_actions)
    state = jax.random.normal(k_state, (B, n_input), jnp.float32)

    mu_ref, sigma_ref = reference_forward(state, params)

    # f32 MXU path: tight match against the f32 reference.
    fwd_f32 = build_critic_forward(params, dot_dtype=jnp.float32)
    mu32, sg32 = jax.block_until_ready(fwd_f32(state))
    assert mu32.shape == (B, n_actions) and sg32.shape == (B, n_actions)
    assert jnp.allclose(mu32, mu_ref, atol=1e-5, rtol=1e-5)
    assert jnp.allclose(sg32, sigma_ref, atol=1e-5, rtol=1e-5)

    # bf16-operand path (v6e/v7x-friendly): loose tolerance vs f32 reference,
    # exact clamp bounds preserved (clip is done in f32).
    fwd_bf16 = build_critic_forward(params, dot_dtype=jnp.bfloat16)
    mu16, sg16 = jax.block_until_ready(fwd_bf16(state))
    assert jnp.allclose(mu16, mu_ref, atol=5e-2, rtol=5e-2)
    assert jnp.allclose(sg16, sigma_ref, atol=5e-2, rtol=5e-2)
    assert bool(jnp.all(sg16 >= 1e-6)) and bool(jnp.all(sg16 <= 1.0))
    assert bool(jnp.all(sg32 >= 1e-6)) and bool(jnp.all(sg32 <= 1.0))

    print("KERNEL_OK")
</pallas_src>

<mosaic_0001>
module attributes {stable_mosaic.version = 11 : i64} {
  func.func @critic_kernel(%arg0: i32, %arg1: memref<8x32xf32, #tpu.memory_space<vmem>>, %arg2: memref<32x256xf32, #tpu.memory_space<vmem>>, %arg3: memref<1x256xf32, #tpu.memory_space<vmem>>, %arg4: memref<256x256xf32, #tpu.memory_space<vmem>>, %arg5: memref<1x256xf32, #tpu.memory_space<vmem>>, %arg6: memref<256x128xf32, #tpu.memory_space<vmem>>, %arg7: memref<1x128xf32, #tpu.memory_space<vmem>>, %arg8: memref<8x128xf32, #tpu.memory_space<vmem>>) attributes {dimension_semantics = [#tpu.dimension_semantics<parallel>], iteration_bounds = array<i64: 1>, scalar_prefetch = 0 : i64, scratch_operands = 0 : i64, tpu.core_type = #tpu.core_type<tc>, window_params = [{transform_indices = @transform_0, window_bounds = array<i64: 8, 32>}, {pipeline_mode = #tpu.pipeline_mode<synchronous>, transform_indices = @transform_1, window_bounds = array<i64: 32, 256>}, {pipeline_mode = #tpu.pipeline_mode<synchronous>, transform_indices = @transform_2, window_bounds = array<i64: 1, 256>}, {pipeline_mode = #tpu.pipeline_mode<synchronous>, transform_indices = @transform_3, window_bounds = array<i64: 256, 256>}, {pipeline_mode = #tpu.pipeline_mode<synchronous>, transform_indices = @transform_4, window_bounds = array<i64: 1, 256>}, {pipeline_mode = #tpu.pipeline_mode<synchronous>, transform_indices = @transform_5, window_bounds = array<i64: 256, 128>}, {pipeline_mode = #tpu.pipeline_mode<synchronous>, transform_indices = @transform_6, window_bounds = array<i64: 1, 128>}, {transform_indices = @transform_7, window_bounds = array<i64: 8, 128>}]} {
    %c0 = arith.constant 0 : index
    %c0_0 = arith.constant 0 : index
    %0 = vector.load %arg1[%c0, %c0_0] : memref<8x32xf32, #tpu.memory_space<vmem>>, vector<8x32xf32>
    %c0_1 = arith.constant 0 : index
    %c0_2 = arith.constant 0 : index
    %1 = vector.load %arg2[%c0_1, %c0_2] : memref<32x256xf32, #tpu.memory_space<vmem>>, vector<32x256xf32>
    %cst = arith.constant dense<0.000000e+00> : vector<8x256xf32>
    %2 = tpu.matmul %0, %1, %cst {dimension_numbers = #tpu.dot_dimension_numbers<[1], [0], [0], [1], [0, 0, 1, 1], [], []>} : vector<8x32xf32>, vector<32x256xf32>, vector<8x256xf32> -> vector<8x256xf32>
    %c0_3 = arith.constant 0 : index
    %c0_4 = arith.constant 0 : index
    %3 = vector.load %arg3[%c0_3, %c0_4] : memref<1x256xf32, #tpu.memory_space<vmem>>, vector<1x256xf32>
    %4 = vector.broadcast %3 : vector<1x256xf32> to vector<8x256xf32>
    %5 = arith.addf %2, %4 : vector<8x256xf32>
    %cst_5 = arith.constant 0.000000e+00 : f32
    %6 = vector.broadcast %cst_5 : f32 to vector<8x256xf32>
    %7 = arith.maximumf %5, %6 : vector<8x256xf32>
    %c0_6 = arith.constant 0 : index
    %c0_7 = arith.constant 0 : index
    %8 = vector.load %arg4[%c0_6, %c0_7] : memref<256x256xf32, #tpu.memory_space<vmem>>, vector<256x256xf32>
    %cst_8 = arith.constant dense<0.000000e+00> : vector<8x256xf32>
    %9 = tpu.matmul %7, %8, %cst_8 {dimension_numbers = #tpu.dot_dimension_numbers<[1], [0], [0], [1], [0, 0, 1, 1], [], []>} : vector<8x256xf32>, vector<256x256xf32>, vector<8x256xf32> -> vector<8x256xf32>
    %c0_9 = arith.constant 0 : index
    %c0_10 = arith.constant 0 : index
    %10 = vector.load %arg5[%c0_9, %c0_10] : memref<1x256xf32, #tpu.memory_space<vmem>>, vector<1x256xf32>
    %11 = vector.broadcast %10 : vector<1x256xf32> to vector<8x256xf32>
    %12 = arith.addf %9, %11 : vector<8x256xf32>
    %cst_11 = arith.constant 0.000000e+00 : f32
    %13 = vector.broadcast %cst_11 : f32 to vector<8x256xf32>
    %14 = arith.maximumf %12, %13 : vector<8x256xf32>
    %c0_12 = arith.constant 0 : index
    %c0_13 = arith.constant 0 : index
    %15 = vector.load %arg6[%c0_12, %c0_13] : memref<256x128xf32, #tpu.memory_space<vmem>>, vector<256x128xf32>
    %cst_14 = arith.constant dense<0.000000e+00> : vector<8x128xf32>
    %16 = tpu.matmul %14, %15, %cst_14 {dimension_numbers = #tpu.dot_dimension_numbers<[1], [0], [0], [1], [0, 0, 1, 1], [], []>} : vector<8x256xf32>, vector<256x128xf32>, vector<8x128xf32> -> vector<8x128xf32>
    %c0_15 = arith.constant 0 : index
    %c0_16 = arith.constant 0 : index
    %17 = vector.load %arg7[%c0_15, %c0_16] : memref<1x128xf32, #tpu.memory_space<vmem>>, vector<1x128xf32>
    %18 = vector.broadcast %17 : vector<1x128xf32> to vector<8x128xf32>
    %19 = arith.addf %16, %18 : vector<8x128xf32>
    %20 = tpu.iota {dimensions = array<i32: 1>} : vector<8x128xi32>
    %c8_i32 = arith.constant 8 : i32
    %21 = vector.broadcast %c8_i32 : i32 to vector<8x128xi32>
    %22 = arith.cmpi sge, %20, %21 : vector<8x128xi32>
    %c16_i32 = arith.constant 16 : i32
    %23 = vector.broadcast %c16_i32 : i32 to vector<8x128xi32>
    %24 = arith.cmpi slt, %20, %23 : vector<8x128xi32>
    %25 = arith.andi %22, %24 : vector<8x128xi1>
    %cst_17 = arith.constant 9.99999997E-7 : f32
    %cst_18 = arith.constant 1.000000e+00 : f32
    %26 = vector.broadcast %cst_17 : f32 to vector<8x128xf32>
    %27 = arith.maximumf %26, %19 : vector<8x128xf32>
    %28 = vector.broadcast %cst_18 : f32 to vector<8x128xf32>
    %29 = arith.minimumf %28, %27 : vector<8x128xf32>
    %30 = arith.select %25, %29, %19 : vector<8x128xi1>, vector<8x128xf32>
    %c0_19 = arith.constant 0 : index
    %c0_20 = arith.constant 0 : index
    %31 = vector.load %arg8[%c0_19, %c0_20] : memref<8x128xf32, #tpu.memory_space<vmem>>, vector<8x128xf32>
    tpu.vector_store %arg8[%c0_19, %c0_20], %30 {strides = array<i32>} : memref<8x128xf32, #tpu.memory_space<vmem>>, vector<8x128xf32>,
    return
  }
  func.func @transform_0(%arg0: i32) -> (i32, i32) {
    %c0_i32 = arith.constant 0 : i32
    %c0_i32_0 = arith.constant 0 : i32
    return %arg0, %c0_i32 : i32, i32
  }
  func.func @transform_1(%arg0: i32) -> (i32, i32) {
    %c0_i32 = arith.constant 0 : i32
    %c0_i32_0 = arith.constant 0 : i32
    %c0_i32_1 = arith.constant 0 : i32
    return %c0_i32, %c0_i32_0 : i32, i32
  }
  func.func @transform_2(%arg0: i32) -> (i32, i32) {
    %c0_i32 = arith.constant 0 : i32
    %c0_i32_0 = arith.constant 0 : i32
    %c0_i32_1 = arith.constant 0 : i32
    return %c0_i32, %c0_i32_0 : i32, i32
  }
  func.func @transform_3(%arg0: i32) -> (i32, i32) {
    %c0_i32 = arith.constant 0 : i32
    %c0_i32_0 = arith.constant 0 : i32
    %c0_i32_1 = arith.constant 0 : i32
    return %c0_i32, %c0_i32_0 : i32, i32
  }
  func.func @transform_4(%arg0: i32) -> (i32, i32) {
    %c0_i32 = arith.constant 0 : i32
    %c0_i32_0 = arith.constant 0 : i32
    %c0_i32_1 = arith.constant 0 : i32
    return %c0_i32, %c0_i32_0 : i32, i32
  }
  func.func @transform_5(%arg0: i32) -> (i32, i32) {
    %c0_i32 = arith.constant 0 : i32
    %c0_i32_0 = arith.constant 0 : i32
    %c0_i32_1 = arith.constant 0 : i32
    return %c0_i32, %c0_i32_0 : i32, i32
  }
  func.func @transform_6(%arg0: i32) -> (i32, i32) {
    %c0_i32 = arith.constant 0 : i32
    %c0_i32_0 = arith.constant 0 : i32
    %c0_i32_1 = arith.constant 0 : i32
    return %c0_i32, %c0_i32_0 : i32, i32
  }
  func.func @transform_7(%arg0: i32) -> (i32, i32) {
    %c0_i32 = arith.constant 0 : i32
    %c0_i32_0 = arith.constant 0 : i32
    return %arg0, %c0_i32 : i32, i32
  }
}

</mosaic_0001>

<bundles_post_ra>
// kernel: forward.1
= control target key start
LH: loop header
LB: loop body
LE: loop exit
PB: predicated region body
PF: predicated region fallthrough
CT: control target
= control target key end

     0   :  { %12 = vsyncpa [#allocation3], 0  ;;  %s616_s0 = inlined_call_operand.hbm [shape: f32[8,32], index: 0, kind: input, shape index: {}]   ;;  %s617_s1 = inlined_call_operand.hbm [shape: f32[32,256], index: 1, kind: input, shape index: {}]   ;;  %s618_s2 = inlined_call_operand.hbm [shape: f32[1,256], index: 2, kind: input, shape index: {}]   ;;  %s619_s3 = inlined_call_operand.hbm [shape: f32[256,256], index: 3, kind: input, shape index: {}]   ;;  %s620_s4 = inlined_call_operand.vmem [shape: f32[1,256], index: 4, kind: input, shape index: {}]   ;;  %s621_s5 = inlined_call_operand.hbm [shape: f32[256,128], index: 5, kind: input, shape index: {}]   ;;  %s622_s6 = inlined_call_operand.vmem [shape: f32[1,128], index: 6, kind: input, shape index: {}]   ;;  %s623_s7 = inlined_call_operand.vmem [shape: f32[8,128], index: 7, kind: output, shape index: {}]  }
   0x1   :  { %13 = vsyncpa [#allocation5], 0  ;;  %s30_s26 = sshll.u32 %s617_s1, 4  ;;  %s31_s26 = int_to_ptr.hbm [resolvable:$true] %s30_s26 }
   0x2   :  { %14 = vsyncpa [#allocation8], 0  ;;  %s543_s27 = smov [#allocation4]   ;;  %s54_s8 = sshll.u32 %s619_s3, 4  ;;  %s55_s8 = int_to_ptr.hbm [resolvable:$true] %s54_s8 }
   0x3   :  { %s32_s28 = sshll.u32 %s543_s27, 4  ;;  %s544_s9 = smov 256   ;;  %s33_s28 = int_to_ptr.vmem [resolvable:$true] %s32_s28 }
   0x4   :  { %s545_s10 = smov 16   ;;  %s546_s11 = smov [#allocation7]  }
   0x5   :  { %38 = dma.hbm_to_vmem [thread:$0]  %s31_s26, 1024, %s33_s28, [#allocation5], %s544_s9, %s544_s9, %s545_s10  }
   0x6   :  { %s56_s12 = sshll.u32 %s546_s11, 4  ;;  %s20_s15 = sshll.u32 %s616_s0, 4  ;;  %s57_s12 = int_to_ptr.vmem [resolvable:$true] %s56_s12  ;;  %s21_s15 = int_to_ptr.hbm [resolvable:$true] %s20_s15 }
   0x7   :  { %62 = dma.hbm_to_vmem [thread:$0]  %s55_s8, 8192, %s57_s12, [#allocation8], %s544_s9, %s544_s9, %s545_s10  }
   0x8   :  { %s44_s17 = sshll.u32 %s618_s2, 4  ;;  %s547_s18 = smov [#allocation2]   ;;  %s45_s17 = int_to_ptr.hbm [resolvable:$true] %s44_s17 }
   0x9   :  { %s22_s19 = sshll.u32 %s547_s18, 4  ;;  %s548_s3 = smov [#allocation6]   ;;  %s23_s19 = int_to_ptr.vmem [resolvable:$true] %s22_s19 }
   0xa   :  { %25 = dma.hbm_to_vmem [thread:$0]  %s21_s15, 128, %s23_s19, [#allocation3]  }
   0xb   :  { %s46_s20 = sshll.u32 %s548_s3, 4  ;;  %s69_s23 = sshll.u32 %s621_s5, 4  ;;  %s47_s20 = int_to_ptr.vmem [resolvable:$true] %s46_s20  ;;  %s70_s23 = int_to_ptr.hbm [resolvable:$true] %s69_s23 }
   0xc   :  { %49 = dma.hbm_to_vmem [thread:$0]  %s45_s17, 32, %s47_s20, [#allocation5]  }
   0xd   :  { %s549_s0 = smov [#allocation9]   ;;  %s550_s25 = smov 128  }
   0xe   :  { %s71_s24 = sshll.u32 %s549_s0, 4  ;;  %s551_s26 = smov 8   ;;  %s72_s24 = int_to_ptr.vmem [resolvable:$true] %s71_s24 }
   0xf   :  { %77 = dma.hbm_to_vmem [thread:$0]  %s70_s23, 4096, %s72_s24, [#allocation8], %s550_s25, %s550_s25, %s551_s26  }
  0x10   :  { %537 = dma.done.wait [#allocation3], 128  }
  0x11   :  { %538 = vsyncadd [#allocation3], 4294967168 }
  0x12   :  { %539 = dma.done.wait [#allocation5], 1056  }
  0x13   :  { %540 = vsyncadd [#allocation5], 4294966240 }
  0x14   :  { %541 = dma.done.wait [#allocation8], 12288  }
  0x15   :  { %542 = vsyncadd [#allocation8], 4294955008  ;;  %v107_v0 = vld [vmem:[#allocation4 + $0x30] sm:$0xff]  ;;  %v105_v1 = vld [vmem:[#allocation4 + $0x20] sm:$0xff]  ;;  %vm115_vm0 = vcmask 261120  }
  0x16   :  { %v108_v2 = vld [vmem:[#allocation4 + $0x38] sm:$0xff]  ;;  %131 = vmatpush.msra.mxu0 %v107_v0  ;;  %v106_v3 = vld [vmem:[#allocation4 + $0x28] sm:$0xff]  ;;  %v103_v4 = vld [vmem:[#allocation4 + $0x10] sm:$0xff] }
  0x17   :  { %151 = vmatpush.msra.mxu1 %v108_v2  ;;  %v104_v5 = vld [vmem:[#allocation4 + $0x18] sm:$0xff]  ;;  %v189_v7 = vld [vmem:[#allocation7 + $0xe0] sm:$0xff]  ;;  %v190_v16 = vld [vmem:[#allocation7 + $0xe8] sm:$0xff] }
  0x18   :  { %132 = vmatpush.msra.mxu0 %v105_v1  ;;  %v191_v6 = vld [vmem:[#allocation7 + $0xf0] sm:$0xff]  ;;  %v101_v8 = vld [vmem:[#allocation4] sm:$0xff]  ;;  %v102_v9 = vld [vmem:[#allocation4 + $0x8] sm:$0xff] }
  0x19   :  { %152 = vmatpush.msra.mxu1 %v106_v3  ;;  %231 = vmatpush.msra.mxu2 %v191_v6  ;;  %v223_v10 = vld [vmem:[#allocation7 + $0x1f0] sm:$0xff]  ;;  %v192_v12 = vld [vmem:[#allocation7 + $0xf8] sm:$0xff]  ;;  %v221_v15 = vld [vmem:[#allocation7 + $0x1e0] sm:$0xff] }
  0x1a   :  { %133 = vmatpush.msra.mxu0 %v103_v4  ;;  %v100_v11 = vld [vmem:[#allocation2] sm:$0xff]  ;;  %251 = vmatpush.msra.mxu3 %v223_v10  ;;  %v222_v17 = vld [vmem:[#allocation7 + $0x1e8] sm:$0xff]  ;;  %v185_v18 = vld [vmem:[#allocation7 + $0xc0] sm:$0xff] }
  0x1b   :  { %153 = vmatpush.msra.mxu1 %v104_v5  ;;  %232 = vmatpush.msra.mxu2 %v189_v7  ;;  %v224_v13 = vld [vmem:[#allocation7 + $0x1f8] sm:$0xff]  ;;  %v187_v14 = vld [vmem:[#allocation7 + $0xd0] sm:$0xff]  ;;  %v217_v23 = vld [vmem:[#allocation7 + $0x1c0] sm:$0xff] }
  0x1c   :  { %134 = vmatpush.msra.mxu0 %v101_v8  ;;  %v219_v19 = vld [vmem:[#allocation7 + $0x1d0] sm:$0xff]  ;;  %252 = vmatpush.msra.mxu3 %v221_v15  ;;  %v188_v20 = vld [vmem:[#allocation7 + $0xd8] sm:$0xff]  ;;  %v186_v24 = vld [vmem:[#allocation7 + $0xc8] sm:$0xff] }
  0x1d   :  { %154 = vmatpush.msra.mxu1 %v102_v9  ;;  %405 = vmatmul.msk.f32.vlgmr.msra.gmra.mxu0 %vm115_vm0, %v100_v11  ;;  %v220_v21 = vld [vmem:[#allocation7 + $0x1d8] sm:$0xff]  ;;  %v183_v22 = vld [vmem:[#allocation7 + $0xb0] sm:$0xff]  ;;  %v218_v25 = vld [vmem:[#allocation7 + $0x1c8] sm:$0xff] }
  0x1e   :  { %406 = vmatmul.msk.f32.vlgmr.msra.gmra.mxu1 %vm115_vm0, %v100_v11  ;;  %271 = vmatpush.msrb.mxu0 %v192_v12  ;;  %v181_v26 = vld [vmem:[#allocation7 + $0xa0] sm:$0xff]  ;;  %v215_v27 = vld [vmem:[#allocation7 + $0x1b0] sm:$0xff]  ;;  %v184_v28 = vld [vmem:[#allocation7 + $0xb8] sm:$0xff] }
  0x1f   :  { %291 = vmatpush.msrb.mxu1 %v224_v13  ;;  %233 = vmatpush.msra.mxu2 %v187_v14  ;;  %v216_v29 = vld [vmem:[#allocation7 + $0x1b8] sm:$0xff]  ;;  %v179_v30 = vld [vmem:[#allocation7 + $0x90] sm:$0xff]  ;;  %v213_v31 = vld [vmem:[#allocation7 + $0x1a0] sm:$0xff] }
  0x20   :  { %272 = vmatpush.msrb.mxu0 %v190_v16  ;;  %253 = vmatpush.msra.mxu3 %v219_v19  ;;  %v182_v32 = vld [vmem:[#allocation7 + $0xa8] sm:$0xff]  ;;  %v177_v34 = vld [vmem:[#allocation7 + $0x80] sm:$0xff]  ;;  %v211_v35 = vld [vmem:[#allocation7 + $0x190] sm:$0xff] }
  0x21   :  { %292 = vmatpush.msrb.mxu1 %v222_v17  ;;  %234 = vmatpush.msra.mxu2 %v185_v18  ;;  %v214_v33 = vld [vmem:[#allocation7 + $0x1a8] sm:$0xff]  ;;  %v180_v36 = vld [vmem:[#allocation7 + $0x98] sm:$0xff]  ;;  %v175_v38 = vld [vmem:[#allocation7 + $0x70] sm:$0xff] }
  0x22   :  { %273 = vmatpush.msrb.mxu0 %v188_v20  ;;  %254 = vmatpush.msra.mxu3 %v217_v23  ;;  %v212_v37 = vld [vmem:[#allocation7 + $0x198] sm:$0xff]  ;;  %v209_v39 = vld [vmem:[#allocation7 + $0x180] sm:$0xff]  ;;  %v178_v40 = vld [vmem:[#allocation7 + $0x88] sm:$0xff] }
  0x23   :  { %293 = vmatpush.msrb.mxu1 %v220_v21  ;;  %235 = vmatpush.msra.mxu2 %v183_v22  ;;  %v210_v41 = vld [vmem:[#allocation7 + $0x188] sm:$0xff]  ;;  %v173_v42 = vld [vmem:[#allocation7 + $0x60] sm:$0xff]  ;;  %v207_v43 = vld [vmem:[#allocation7 + $0x170] sm:$0xff] }
  0x24   :  { %274 = vmatpush.msrb.mxu0 %v186_v24  ;;  %255 = vmatpush.msra.mxu3 %v215_v27  ;;  %v176_v44 = vld [vmem:[#allocation7 + $0x78] sm:$0xff]  ;;  %v171_v46 = vld [vmem:[#allocation7 + $0x50] sm:$0xff]  ;;  %v205_v47 = vld [vmem:[#allocation7 + $0x160] sm:$0xff] }
  0x25   :  { %294 = vmatpush.msrb.mxu1 %v218_v25  ;;  %236 = vmatpush.msra.mxu2 %v181_v26  ;;  %v208_v45 = vld [vmem:[#allocation7 + $0x178] sm:$0xff]  ;;  %v174_v48 = vld [vmem:[#allocation7 + $0x68] sm:$0xff]  ;;  %v169_v50 = vld [vmem:[#allocation7 + $0x40] sm:$0xff] }
  0x26   :  { %275 = vmatpush.msrb.mxu0 %v184_v28  ;;  %256 = vmatpush.msra.mxu3 %v213_v31  ;;  %v206_v49 = vld [vmem:[#allocation7 + $0x168] sm:$0xff]  ;;  %v203_v51 = vld [vmem:[#allocation7 + $0x150] sm:$0xff]  ;;  %v172_v52 = vld [vmem:[#allocation7 + $0x58] sm:$0xff] }
  0x27   :  { %295 = vmatpush.msrb.mxu1 %v216_v29  ;;  %237 = vmatpush.msra.mxu2 %v179_v30  ;;  %v204_v53 = vld [vmem:[#allocation7 + $0x158] sm:$0xff]  ;;  %v167_v54 = vld [vmem:[#allocation7 + $0x30] sm:$0xff]  ;;  %v201_v55 = vld [vmem:[#allocation7 + $0x140] sm:$0xff] }
  0x28   :  { %276 = vmatpush.msrb.mxu0 %v182_v32  ;;  %257 = vmatpush.msra.mxu3 %v211_v35  ;;  %v170_v56 = vld [vmem:[#allocation7 + $0x48] sm:$0xff]  ;;  %v168_v58 = vld [vmem:[#allocation7 + $0x38] sm:$0xff]  ;;  %v165_v59 = vld [vmem:[#allocation7 + $0x20] sm:$0xff] }
  0x29   :  { %296 = vmatpush.msrb.mxu1 %v214_v33  ;;  %238 = vmatpush.msra.mxu2 %v177_v34  ;;  %v202_v57 = vld [vmem:[#allocation7 + $0x148] sm:$0xff]  ;;  %v199_v60 = vld [vmem:[#allocation7 + $0x130] sm:$0xff]  ;;  %v200_v62 = vld [vmem:[#allocation7 + $0x138] sm:$0xff] }
  0x2a   :  { %277 = vmatpush.msrb.mxu0 %v180_v36  ;;  %258 = vmatpush.msra.mxu3 %v209_v39  ;;  %v166_v61 = vld [vmem:[#allocation7 + $0x28] sm:$0xff]  ;;  %v163_v63 = vld [vmem:[#allocation7 + $0x10] sm:$0xff]  ;;  %v197_v0 = vld [vmem:[#allocation7 + $0x120] sm:$0xff] }
  0x2b   :  { %297 = vmatpush.msrb.mxu1 %v212_v37  ;;  %239 = vmatpush.msra.mxu2 %v175_v38  ;;  %v164_v1 = vld [vmem:[#allocation7 + $0x18] sm:$0xff]  ;;  %v198_v2 = vld [vmem:[#allocation7 + $0x128] sm:$0xff]  ;;  %v161_v3 = vld [vmem:[#allocation7] sm:$0xff] }
  0x2c   :  { %278 = vmatpush.msrb.mxu0 %v178_v40  ;;  %259 = vmatpush.msra.mxu3 %v207_v43  ;;  %v195_v4 = vld [vmem:[#allocation7 + $0x110] sm:$0xff]  ;;  %v162_v5 = vld [vmem:[#allocation7 + $0x8] sm:$0xff]  ;;  %v196_v6 = vld [vmem:[#allocation7 + $0x118] sm:$0xff] }
  0x2d   :  { %298 = vmatpush.msrb.mxu1 %v210_v41  ;;  %240 = vmatpush.msra.mxu2 %v173_v42  ;;  %v193_v7 = vld [vmem:[#allocation7 + $0x100] sm:$0xff]  ;;  %v194_v8 = vld [vmem:[#allocation7 + $0x108] sm:$0xff]  ;;  %v344_v9 = vld [vmem:[#allocation9 + $0xf8] sm:$0xff] }
  0x2e   :  { %279 = vmatpush.msrb.mxu0 %v176_v44  ;;  %260 = vmatpush.msra.mxu3 %v205_v47  ;;  %v343_v10 = vld [vmem:[#allocation9 + $0xf0] sm:$0xff]  ;;  %v328_v11 = vld [vmem:[#allocation9 + $0x78] sm:$0xff]  ;;  %v342_v13 = vld [vmem:[#allocation9 + $0xe8] sm:$0xff] }
  0x2f   :  { %299 = vmatpush.msrb.mxu1 %v208_v45  ;;  %241 = vmatpush.msra.mxu2 %v171_v46  ;;  %v327_v12 = vld [vmem:[#allocation9 + $0x70] sm:$0xff]  ;;  %v326_v14 = vld [vmem:[#allocation9 + $0x68] sm:$0xff]  ;;  %v341_v15 = vld [vmem:[#allocation9 + $0xe0] sm:$0xff] }
  0x30   :  { %280 = vmatpush.msrb.mxu0 %v174_v48  ;;  %261 = vmatpush.msra.mxu3 %v203_v51  ;;  %v325_v16 = vld [vmem:[#allocation9 + $0x60] sm:$0xff]  ;;  %v340_v17 = vld [vmem:[#allocation9 + $0xd8] sm:$0xff]  ;;  %v339_v19 = vld [vmem:[#allocation9 + $0xd0] sm:$0xff] }
  0x31   :  { %300 = vmatpush.msrb.mxu1 %v206_v49  ;;  %242 = vmatpush.msra.mxu2 %v169_v50  ;;  %v324_v18 = vld [vmem:[#allocation9 + $0x58] sm:$0xff]  ;;  %v323_v20 = vld [vmem:[#allocation9 + $0x50] sm:$0xff]  ;;  %v338_v21 = vld [vmem:[#allocation9 + $0xc8] sm:$0xff] }
  0x32   :  { %281 = vmatpush.msrb.mxu0 %v172_v52  ;;  %262 = vmatpush.msra.mxu3 %v201_v55  ;;  %v322_v22 = vld [vmem:[#allocation9 + $0x48] sm:$0xff]  ;;  %v337_v23 = vld [vmem:[#allocation9 + $0xc0] sm:$0xff]  ;;  %v336_v25 = vld [vmem:[#allocation9 + $0xb8] sm:$0xff] }
  0x33   :  { %301 = vmatpush.msrb.mxu1 %v204_v53  ;;  %243 = vmatpush.msra.mxu2 %v167_v54  ;;  %v321_v24 = vld [vmem:[#allocation9 + $0x40] sm:$0xff]  ;;  %v320_v26 = vld [vmem:[#allocation9 + $0x38] sm:$0xff]  ;;  %v335_v27 = vld [vmem:[#allocation9 + $0xb0] sm:$0xff] }
  0x34   :  { %282 = vmatpush.msrb.mxu0 %v170_v56  ;;  %263 = vmatpush.msra.mxu3 %v199_v60  ;;  %v334_v28 = vld [vmem:[#allocation9 + $0xa8] sm:$0xff]  ;;  %v109_v29 = vld [vmem:[#allocation6] sm:$0x3]  ;;  %v333_v30 = vld [vmem:[#allocation9 + $0xa0] sm:$0xff] }
  0x35   :  { %302 = vmatpush.msrb.mxu1 %v202_v57  ;;  %244 = vmatpush.msra.mxu2 %v165_v59  ;;  %v111_v31 = vperm.slane %v109_v29, 0  ;;  %v112_v32 = vperm.slane %v109_v29, 1  ;;  %v319_v39 = vld [vmem:[#allocation9 + $0x30] sm:$0xff]  ;;  %v332_v40 = vld [vmem:[#allocation9 + $0x98] sm:$0xff]  ;;  %v318_v41 = vld [vmem:[#allocation9 + $0x28] sm:$0xff] }
  0x36   :  { %283 = vmatpush.msrb.mxu0 %v168_v58  ;;  %264 = vmatpush.msra.mxu3 %v197_v0  ;;  %v331_v42 = vld [vmem:[#allocation9 + $0x90] sm:$0xff]  ;;  %v317_v43 = vld [vmem:[#allocation9 + $0x20] sm:$0xff]  ;;  %v330_v44 = vld [vmem:[#allocation9 + $0x88] sm:$0xff] }
  0x37   :  { %303 = vmatpush.msrb.mxu1 %v200_v62  ;;  %245 = vmatpush.msra.mxu2 %v163_v63  ;;  %v316_v45 = vld [vmem:[#allocation9 + $0x18] sm:$0xff]  ;;  %v329_v46 = vld [vmem:[#allocation9 + $0x80] sm:$0xff]  ;;  %v315_v47 = vld [vmem:[#allocation9 + $0x10] sm:$0xff]  ;;  %v389_v63 = vlaneseq }
  0x38   :  { %284 = vmatpush.msrb.mxu0 %v166_v61  ;;  %265 = vmatpush.msra.mxu3 %v195_v4  ;;  %v314_v48 = vld [vmem:[#allocation9 + $0x8] sm:$0xff]  ;;  %v313_v49 = vld [vmem:[#allocation9] sm:$0xff]  ;;  %v225_v50 = vld [vmem:[%s620_s4] sm:$0x3] }
  0x39   :  { %304 = vmatpush.msrb.mxu1 %v198_v2  ;;  %246 = vmatpush.msra.mxu2 %v161_v3  ;;  %v228_v51 = vperm.slane %v225_v50, 1  ;;  %v227_v56 = vperm.slane %v225_v50, 0  ;;  %v416_v0 = vld [vmem:[%s622_s6] ss:$0 sm:$0xff] }
  0x3a   :  { %285 = vmatpush.msrb.mxu0 %v164_v1  ;;  %266 = vmatpush.msra.mxu3 %v193_v7  ;;  %v390_v1 = vand.u32 127, %v389_v63 }
  0x3b   :  { %305 = vmatpush.msrb.mxu1 %v196_v6  ;;  %349 = vmatpush.msrb.mxu2 %v328_v11 }
  0x3c   :  { %286 = vmatpush.msrb.mxu0 %v162_v5  ;;  %369 = vmatpush.msrb.mxu3 %v344_v9  ;;  %vm391_vm1 = vcmp.ge.s32.totalorder %v390_v1, 8  ;;  %vm392_vm2 = vcmp.lt.s32.totalorder %v390_v1, 16 }
  0x3d   :  { %306 = vmatpush.msrb.mxu1 %v194_v8  ;;  %350 = vmatpush.msrb.mxu2 %v327_v12  ;;  %vm393_vm3 = vmand %vm391_vm1, %vm392_vm2 }
  0x3e   :  { %370 = vmatpush.msrb.mxu3 %v343_v10 }
  0x3f   :  { %351 = vmatpush.msrb.mxu2 %v326_v14 }
  0x40   :  { %371 = vmatpush.msrb.mxu3 %v342_v13 }
  0x41   :  { %352 = vmatpush.msrb.mxu2 %v325_v16 }
  0x42   :  { %372 = vmatpush.msrb.mxu3 %v341_v15 }
  0x43   :  { %353 = vmatpush.msrb.mxu2 %v324_v18 }
  0x44   :  { %373 = vmatpush.msrb.mxu3 %v340_v17 }
  0x45   :  { %354 = vmatpush.msrb.mxu2 %v323_v20 }
  0x46   :  { %374 = vmatpush.msrb.mxu3 %v339_v19 }
  0x47   :  { %355 = vmatpush.msrb.mxu2 %v322_v22 }
  0x48   :  { %375 = vmatpush.msrb.mxu3 %v338_v21 }
  0x49   :  { %356 = vmatpush.msrb.mxu2 %v321_v24 }
  0x4a   :  { %376 = vmatpush.msrb.mxu3 %v337_v23 }
  0x4b   :  { %357 = vmatpush.msrb.mxu2 %v320_v26 }
  0x4c   :  { %377 = vmatpush.msrb.mxu3 %v336_v25 }
  0x4d   :  { %358 = vmatpush.msrb.mxu2 %v319_v39 }
  0x4e   :  { %378 = vmatpush.msrb.mxu3 %v335_v27 }
  0x4f   :  { %359 = vmatpush.msrb.mxu2 %v318_v41 }
  0x50   :  { %379 = vmatpush.msrb.mxu3 %v334_v28 }
  0x51   :  { %360 = vmatpush.msrb.mxu2 %v317_v43 }
  0x52   :  { %380 = vmatpush.msrb.mxu3 %v333_v30 }
  0x53   :  { %361 = vmatpush.msrb.mxu2 %v316_v45 }
  0x54   :  { %381 = vmatpush.msrb.mxu3 %v332_v40 }
  0x55   :  { %362 = vmatpush.msrb.mxu2 %v315_v47 }
  0x56   :  { %382 = vmatpush.msrb.mxu3 %v331_v42 }
  0x57   :  { %363 = vmatpush.msrb.mxu2 %v314_v48 }
  0x58   :  { %383 = vmatpush.msrb.mxu3 %v330_v44 }
  0x59   :  { %364 = vmatpush.msrb.mxu2 %v313_v49 }
  0x5a   :  { %384 = vmatpush.msrb.mxu3 %v329_v46 }
  0x9a   :  { %v136_v33 = vpop.f32.mrf.mxu0 }
  0x9b   :  { %v156_v34 = vpop.f32.mrf.mxu1  ;;  %v137_v35 = vadd.f32 %v136_v33, %v111_v31 }
  0x9c   :  { %v157_v36 = vadd.f32 %v156_v34, %v112_v32 }
  0x9d   :  { %v159_v37 = vmax.f32 %v137_v35, 0.0 }
  0x9e   :  { %v160_v38 = vmax.f32 %v157_v36, 0.0 }
  0x9f   :  { %247 = vmatmul.f32.vlgmr.msra.gmra.mxu2 %v159_v37  ;;  %287 = vmatmul.f32.vlgmr.msrb.gmra.mxu0 %v159_v37 }
  0xa0   :  { %267 = vmatmul.f32.vlgmr.msra.gmra.mxu3 %v160_v38  ;;  %307 = vmatmul.f32.vlgmr.msrb.gmra.mxu1 %v160_v38 }
 0x11c   :  { %v288_v52 = vpop.f32.mrf.mxu0 }
 0x11d   :  { %v289_v53 = vadd.f32 %v288_v52, %v228_v51  ;;  %v308_v54 = vpop.f32.mrf.mxu1 }
 0x11f   :  { %v309_v55 = vadd.f32 %v308_v54, %v289_v53 }
 0x121   :  { %v312_v57 = vmax.f32 %v309_v55, 0.0 }
 0x122   :  { %v248_v58 = vpop.f32.mrf.mxu2 }
 0x123   :  { %v249_v59 = vadd.f32 %v248_v58, %v227_v56  ;;  %385 = vmatmul.f32.vlgmr.msrb.gmra.mxu3 %v312_v57  ;;  %v268_v60 = vpop.f32.mrf.mxu3 }
 0x125   :  { %v269_v61 = vadd.f32 %v268_v60, %v249_v59 }
 0x127   :  { %v311_v62 = vmax.f32 %v269_v61, 0.0 }
 0x129   :  { %365 = vmatmul.f32.vlgmr.msrb.gmra.mxu2 %v311_v62 }
 0x1a6   :  { %v386_v4 = vpop.f32.mrf.mxu3 }
 0x1ac   :  { %v366_v2 = vpop.f32.mrf.mxu2 }
 0x1ad   :  { %v367_v3 = vadd.f32 %v416_v0, %v366_v2 }
 0x1af   :  { %v387_v5 = vadd.f32 %v386_v4, %v367_v3 }
 0x1b1   :  { %v394_v6 = vmax.f32 %v387_v5, 1e-06 }
 0x1b3   :  { %v395_v7 = vmin.f32 %v394_v6, 1.0 }
 0x1b5   :  { %v396_v8 = vsel %vm393_vm3, %v395_v7, %v387_v5 }
 0x1b6   :  { %397 = vst [vmem:[%s623_s7] sm:$0xff] %v396_v8 }
 0x1b7   :  { %402 = vsyncpa [#allocation3], 1 }
 0x1b8   :  { %403 = vsyncpa [#allocation5], 1 }
 0x1b9   :  { %404 = vsyncpa [#allocation8], 1 }

</bundles_post_ra>
